<compile_context>
chip_gen: v6e
topology: v6e:2x2x1
jax: 0.10.0
libtpu: 0.0.40
codegen_flags: <defaults>
</compile_context>

<pallas_src>
import jax
import jax.numpy as jnp
from jax.experimental import pallas as pl
from jax.experimental.pallas import tpu as pltpu

_TINY_ELEMS = 64 * 1024  # below this, fused XLA beats pallas_call launch cost


def _round_up(a, b):
    return (a + b - 1) // b * b


def _swish_kernel(x_ref, o_ref):
    x = x_ref[...]
    if x.dtype in (jnp.bfloat16, jnp.float16):
        # Native low-precision math (bf16 VPU/EUP on v6e/v7x): one EUP tanh +
        # two VALU ops per element keeps the kernel HBM-bound even at v7x's
        # ~800 Gelem/s bf16 demand.  swish(x) = h + h*tanh(h), h = x/2 — exact
        # rewrite of x*sigmoid(x), no exp overflow for any finite x.
        h = x * 0.5
        o_ref[...] = (h * jnp.tanh(h) + h).astype(o_ref.dtype)
    else:
        xf = x.astype(jnp.float32)
        h = xf * 0.5
        o_ref[...] = (h * jnp.tanh(h) + h).astype(o_ref.dtype)


def _chip_budget():
    """Per-generation (target_block_bytes, vmem_limit_cap_bytes)."""
    try:
        vmem_phys = pltpu.get_tpu_info().vmem_capacity_bytes
    except Exception:
        vmem_phys = 64 << 20  # be conservative: assume v7x-sized VMEM
    if vmem_phys <= (64 << 20):
        # v7x: 64 MiB VMEM, 3.2 TB/s HBM.  8 MiB blocks -> 32 MiB of double
        # buffers (safe ceiling); ~0.35us per-step cost is <7% of HBM time.
        return 8 << 20, 40 << 20
    # v5e/v6e: 128 MiB VMEM; larger blocks are a small free win.
    return 16 << 20, 80 << 20


def _swish_pallas_2d(x2d, *, target_block_bytes, vmem_cap_bytes):
    """Run the swish kernel on a lane-dense (rows, lane) array."""
    rows, lane = x2d.shape
    itemsize = x2d.dtype.itemsize
    # Packed-sublane granule: 8 rows f32, 16 bf16/f16, 32 int8/fp8.
    row_granule = max(8, 8 * (4 // itemsize))

    block_rows = max(
        row_granule,
        (target_block_bytes // (lane * itemsize)) // row_granule * row_granule,
    )
    if rows >= 2 * row_granule:
        # Guarantee >= 2 grid steps so the "parallel" axis can shard across
        # both v7x TensorCores (no-op cost on single-TC v5e/v6e).
        block_rows = min(block_rows, _round_up((rows + 1) // 2, row_granule))
    if block_rows >= rows:
        block_rows = rows  # single full-extent block (always layout-legal)

    grid = (pl.cdiv(rows, block_rows),)
    block_bytes = block_rows * lane * itemsize
    # in + out, double-buffered, plus slack for compiler-internal scratch.
    vmem_limit = int(min(vmem_cap_bytes, 4 * block_bytes + (4 << 20)))

    n = rows * lane
    return pl.pallas_call(
        _swish_kernel,
        out_shape=jax.ShapeDtypeStruct((rows, lane), x2d.dtype),
        grid_spec=pltpu.PrefetchScalarGridSpec(
            num_scalar_prefetch=0,
            grid=grid,
            in_specs=[pl.BlockSpec((block_rows, lane), lambda i: (i, 0))],
            out_specs=pl.BlockSpec((block_rows, lane), lambda i: (i, 0)),
        ),
        compiler_params=pltpu.CompilerParams(
            dimension_semantics=("parallel",),
            vmem_limit_bytes=vmem_limit,
        ),
        cost_estimate=pl.CostEstimate(
            flops=4 * n,
            transcendentals=n,
            bytes_accessed=2 * n * itemsize,
        ),
        # NOTE: input_output_aliases={0: 0} would mirror the torch in-place
        # semantics and halve the HBM footprint when callers donate x; left
        # off so non-donating callers don't pay a defensive copy.
    )(x2d)


def swish(x, *, min_pallas_elems=_TINY_ELEMS):
    """Elementwise swish matching torch `x * F.sigmoid(x)` (the module's
    in-place flag is functionally irrelevant)."""
    n = x.size
    if n == 0:
        return x
    if n < min_pallas_elems:
        # Fused XLA elementwise op — faster than a pallas_call for tiny inputs.
        return (x * jax.nn.sigmoid(x)).astype(x.dtype)

    orig_shape = x.shape
    dtype = x.dtype
    itemsize = dtype.itemsize
    target_block_bytes, vmem_cap_bytes = _chip_budget()

    # Widest lane-dense last dim that divides n exactly -> zero-copy reshape.
    lane = None
    for cand in (2048, 1024, 512, 256, 128):
        if n % cand == 0:
            lane = cand
            break

    if lane is not None:
        x2d = jnp.ravel(x).reshape(n // lane, lane)
        out2d = _swish_pallas_2d(
            x2d,
            target_block_bytes=target_block_bytes,
            vmem_cap_bytes=vmem_cap_bytes,
        )
        return out2d.reshape(orig_shape)

    # Ragged case (n % 128 != 0): run the 128-aligned bulk through Pallas and
    # the tiny tail through jnp — no full pad/slice HBM round trips.
    row_granule = max(8, 8 * (4 // itemsize))
    align = row_granule * 128
    bulk_n = (n // align) * align
    x_flat = jnp.ravel(x)
    out_bulk = _swish_pallas_2d(
        x_flat[:bulk_n].reshape(bulk_n // 128, 128),
        target_block_bytes=target_block_bytes,
        vmem_cap_bytes=vmem_cap_bytes,
    )
    tail = x_flat[bulk_n:]
    out_tail = (tail * jax.nn.sigmoid(tail)).astype(dtype)
    out_flat = jnp.concatenate([out_bulk.reshape(-1), out_tail])
    return out_flat.reshape(orig_shape)


if __name__ == "__main__":
    key = jax.random.PRNGKey(0)

    # Small NCHW input consistent with the backbone's conv activations.
    # Force the Pallas path (default routing would send something this tiny
    # through the fused-XLA fast path).
    x = jax.random.normal(key, (2, 4, 16, 16), dtype=jnp.float32)
    y = jax.block_until_ready(swish(x, min_pallas_elems=0))
    y_ref = x * jax.nn.sigmoid(x)
    assert y.shape == x.shape and y.dtype == x.dtype
    assert jnp.allclose(y, y_ref, atol=1e-5, rtol=1e-5)

    # Default routing on the same tiny tensor (fast path).
    y_fast = jax.block_until_ready(swish(x))
    assert jnp.allclose(y_fast, y_ref, atol=1e-5, rtol=1e-5)

    # Slightly larger activation that takes the default Pallas route and a
    # >= 2-block grid.
    x1 = jax.random.normal(jax.random.PRNGKey(2), (2, 32, 32, 32), dtype=jnp.float32)
    y1 = jax.block_until_ready(swish(x1))
    y1_ref = x1 * jax.nn.sigmoid(x1)
    assert y1.shape == x1.shape and y1.dtype == x1.dtype
    assert jnp.allclose(y1, y1_ref, atol=1e-5, rtol=1e-5)

    # Ragged flat size (not a multiple of 128): Pallas bulk + jnp tail.
    x2 = jax.random.normal(jax.random.PRNGKey(1), (3, 5, 7, 13), dtype=jnp.float32)
    y2 = jax.block_until_ready(swish(x2, min_pallas_elems=0))
    y2_ref = x2 * jax.nn.sigmoid(x2)
    assert y2.shape == x2.shape and y2.dtype == x2.dtype
    assert jnp.allclose(y2, y2_ref, atol=1e-5, rtol=1e-5)

    print("KERNEL_OK")
</pallas_src>

<mosaic_0001>
module attributes {stable_mosaic.version = 11 : i64} {
  func.func @_swish_kernel(%arg0: i32, %arg1: memref<1x2048xf32, #tpu.memory_space<vmem>>, %arg2: memref<1x2048xf32, #tpu.memory_space<vmem>>) attributes {dimension_semantics = [#tpu.dimension_semantics<parallel>], iteration_bounds = array<i64: 1>, scalar_prefetch = 0 : i64, scratch_operands = 0 : i64, tpu.core_type = #tpu.core_type<tc>, window_params = [{transform_indices = @transform_0, window_bounds = array<i64: 1, 2048>}, {transform_indices = @transform_1, window_bounds = array<i64: 1, 2048>}]} {
    %c0 = arith.constant 0 : index
    %c0_0 = arith.constant 0 : index
    %0 = vector.load %arg1[%c0, %c0_0] : memref<1x2048xf32, #tpu.memory_space<vmem>>, vector<1x2048xf32>
    %cst = arith.constant 5.000000e-01 : f32
    %1 = vector.broadcast %cst : f32 to vector<1x2048xf32>
    %2 = arith.mulf %0, %1 : vector<1x2048xf32>
    %3 = math.tanh %2 : vector<1x2048xf32>
    %4 = arith.mulf %2, %3 : vector<1x2048xf32>
    %5 = arith.addf %4, %2 : vector<1x2048xf32>
    %c0_1 = arith.constant 0 : index
    %c0_2 = arith.constant 0 : index
    %6 = vector.load %arg2[%c0_1, %c0_2] : memref<1x2048xf32, #tpu.memory_space<vmem>>, vector<1x2048xf32>
    tpu.vector_store %arg2[%c0_1, %c0_2], %5 {strides = array<i32>} : memref<1x2048xf32, #tpu.memory_space<vmem>>, vector<1x2048xf32>,
    return
  }
  func.func @transform_0(%arg0: i32) -> (i32, i32) {
    %c0_i32 = arith.constant 0 : i32
    %c0_i32_0 = arith.constant 0 : i32
    return %arg0, %c0_i32 : i32, i32
  }
  func.func @transform_1(%arg0: i32) -> (i32, i32) {
    %c0_i32 = arith.constant 0 : i32
    %c0_i32_0 = arith.constant 0 : i32
    return %arg0, %c0_i32 : i32, i32
  }
}

</mosaic_0001>

<bundles_post_ra>
// kernel: tpu_custom_call.1
= control target key start
LH: loop header
LB: loop body
LE: loop exit
PB: predicated region body
PF: predicated region fallthrough
CT: control target
= control target key end

     0   :  { %6 = vsyncpa [#allocation3], 0  ;;  %s116_s0 = inlined_call_operand.hbm [shape: f32[1,2048], index: 0, kind: input, shape index: {}]   ;;  %s117_s1 = inlined_call_operand.hbm [shape: f32[1,2048], index: 1, kind: output, shape index: {}]  }
   0x1   :  { %7 = vsyncpa [#allocation4], 0  ;;  %s98_s6 = smov [#allocation2]  }
   0x2   :  { %s14_s7 = sshll.u32 %s98_s6, 4  ;;  %s15_s7 = int_to_ptr.vmem [resolvable:$true] %s14_s7 }
   0x3   :  { %s62_s8 = scalar_lea.vmem %s15_s7, 256  ;;  %p67_p1 = scmp.lt.s32.totalorder %s15_s7, %s15_s7 }
   0x4   :  { %p63_p0 = scmp.ne.s32.totalorder %s15_s7, %s62_s8  ;;  %p68_p2 = scmp.lt.s32.totalorder %s62_s8, %s62_s8 }
   0x6   :  { %p69_p3 = por %p68_p2, %p67_p1 }
   0x8   :  { %p70_p4 = pnand %p69_p3, %p63_p0 }
   0xa   :  { %73 = shalt.err (!%p70_p4)
}
   0xb   :  { %17 = dma.hbm_to_vmem [thread:$0]  %s116_s0, 256, %s15_s7, [#allocation3]  }
   0xc   :  { %94 = dma.done.wait [#allocation3], 256  }
   0xd   :  { %95 = vsyncadd [#allocation3], 4294967040  ;;  %v21_v0 = vld [vmem:[#allocation2] sm:$0xff]  ;;  %v22_v1 = vld [vmem:[#allocation2 + $0x8] sm:$0xff]  ;;  %s99_s11 = smov [#allocation5]  }
   0xe   :  { %v23_v2 = vmul.f32 0.5, %v21_v0  ;;  %v24_v3 = vmul.f32 0.5, %v22_v1  ;;  %s39_s12 = sshll.u32 %s99_s11, 4  ;;  %s40_s12 = int_to_ptr.vmem [resolvable:$true] %s39_s12 }
   0xf   :  { %s74_s0 = scalar_lea.vmem %s40_s12, 256  ;;  %p79_p6 = scmp.lt.s32.totalorder %s40_s12, %s40_s12 }
  0x10   :  { %50 = vtanh.f32 %v23_v2  ;;  %p75_p5 = scmp.ne.s32.totalorder %s40_s12, %s74_s0  ;;  %p80_p7 = scmp.lt.s32.totalorder %s74_s0, %s74_s0 }
  0x11   :  { %52 = vtanh.f32 %v24_v3 }
  0x12   :  { %p81_p8 = por %p80_p7, %p79_p6 }
  0x14   :  { %p82_p9 = pnand %p81_p8, %p75_p5 }
  0x1d   :  { %v51_v4 = vpop.eup %50 }
  0x1e   :  { %v53_v5 = vpop.eup %52  ;;  %v27_v6 = vmul.f32 %v51_v4, %v23_v2 }
  0x1f   :  { %v28_v7 = vmul.f32 %v53_v5, %v24_v3 }
  0x20   :  { %v29_v8 = vadd.f32 %v27_v6, %v23_v2 }
  0x21   :  { %v30_v9 = vadd.f32 %v28_v7, %v24_v3 }
  0x22   :  { %31 = vst [vmem:[#allocation5] sm:$0xff] %v29_v8 }
  0x23   :  { %32 = vst [vmem:[#allocation5 + $0x8] sm:$0xff] %v30_v9 }
  0x24   :  { %85 = shalt.err (!%p82_p9)
}
  0x25   :  { %42 = dma.vmem_to_hbm [thread:$0]  %s40_s12, 256, %s117_s1, [#allocation4]  }
  0x26   :  { %96 = dma.done.wait [#allocation4], 256  }
  0x27   :  { %97 = vsyncadd [#allocation4], 4294967040 }
  0x28   :  { %46 = vsyncpa [#allocation3], 1 }
  0x29   :  { %47 = vsyncpa [#allocation4], 1 }

</bundles_post_ra>
